<compile_context>
chip_gen: v5e
topology: v5e:2x2
jax: 0.10.0
libtpu: 0.0.40
codegen_flags: <defaults>
</compile_context>

<pallas_src>
import jax
import jax.numpy as jnp
from jax.experimental import pallas as pl
from jax.experimental.pallas import tpu as pltpu

IN_DIM = 28 * 28 * 1   # 784
HIDDEN = 28
OUT_PAD = 128          # lane-dense output width (real classes = 10)


def mnist_mlp_kernel(x_ref, w1_ref, b1_ref, w2_ref, b2_ref, out_ref):
    # fc1: (TILE_N, 784) f32 @ (784, 28) f32 -> f32 acc, + (1, 28) f32.
    h = (
        jnp.dot(x_ref[...], w1_ref[...], preferred_element_type=jnp.float32)
        + b1_ref[...]
    )
    h = jnp.maximum(h, 0.0)  # ReLU
    # fc2 lane-padded to 128 output columns: padded cols have zero weights and
    # a -inf bias, so exp(pad - max) == 0 and they never affect the softmax.
    logits = (
        jnp.dot(h, w2_ref[...], preferred_element_type=jnp.float32) + b2_ref[...]
    )
    # Numerically stable log_softmax along dim=-1 (row-local).
    m = jnp.max(logits, axis=-1, keepdims=True)
    shifted = logits - m
    lse = jnp.log(jnp.sum(jnp.exp(shifted), axis=-1, keepdims=True))
    out_ref[...] = shifted - lse


def _round_up(x, m):
    return ((x + m - 1) // m) * m


def mnist_net_forward(x_nchw, w1, b1, w2, b2, *, max_tile_n=4096, min_grid_steps=4):
    """Forward pass of MnistNet.

    x_nchw: (N, 1, 28, 28) float32
    w1: (784, 28), b1: (28,), w2: (28, 10), b2: (10,)  (pre-transposed (in, out))
    returns: (N, 10) log-probabilities, float32
    """
    n = x_nchw.shape[0]
    n_classes = w2.shape[1]

    # Contiguous reshape only (metadata / free in XLA); NO dtype cast and NO
    # pad — we avoid any extra full HBM pass over x in this HBM-bound kernel.
    x_flat = x_nchw.reshape(n, IN_DIM).astype(jnp.float32)

    b1_2d = b1.reshape(1, -1).astype(jnp.float32)
    # Lane-pad fc2 to 128 output columns (zero weights, -inf bias).
    w2_p = jnp.zeros((HIDDEN, OUT_PAD), jnp.float32).at[:, :n_classes].set(
        w2.astype(jnp.float32)
    )
    b2_p = jnp.full((1, OUT_PAD), -jnp.inf, jnp.float32).at[0, :n_classes].set(
        b2.astype(jnp.float32)
    )

    # Batch tile: as large as useful (<= max_tile_n), but sized so there are at
    # least `min_grid_steps` grid steps when the batch allows it (v7x megacore
    # sharding + pipeline overlap). Multiple of 8 for f32 sublane alignment.
    tile_n = max(8, min(max_tile_n, _round_up(pl.cdiv(n, min_grid_steps), 8)))
    grid = (pl.cdiv(n, tile_n),)  # uneven last block is masked by Pallas

    flops = 2 * n * (IN_DIM * HIDDEN + HIDDEN * OUT_PAD) + 6 * n * OUT_PAD
    transcendentals = n * (OUT_PAD + 1)  # exp per lane + log per row
    bytes_accessed = 4 * (
        n * IN_DIM + n * OUT_PAD + IN_DIM * HIDDEN + HIDDEN * OUT_PAD + HIDDEN + OUT_PAD
    )

    out_padded = pl.pallas_call(
        mnist_mlp_kernel,
        out_shape=jax.ShapeDtypeStruct((n, OUT_PAD), jnp.float32),
        grid=grid,
        in_specs=[
            pl.BlockSpec((tile_n, IN_DIM), lambda i: (i, 0)),    # x batch tiles
            pl.BlockSpec((IN_DIM, HIDDEN), lambda i: (0, 0)),    # w1 resident
            pl.BlockSpec((1, HIDDEN), lambda i: (0, 0)),         # b1 resident
            pl.BlockSpec((HIDDEN, OUT_PAD), lambda i: (0, 0)),   # w2 resident
            pl.BlockSpec((1, OUT_PAD), lambda i: (0, 0)),        # b2 resident
        ],
        out_specs=pl.BlockSpec((tile_n, OUT_PAD), lambda i: (i, 0)),
        compiler_params=pltpu.CompilerParams(
            dimension_semantics=("parallel",),
            vmem_limit_bytes=48 * 1024 * 1024,
        ),
        cost_estimate=pl.CostEstimate(
            flops=flops,
            transcendentals=transcendentals,
            bytes_accessed=bytes_accessed,
        ),
    )(x_flat, w1.astype(jnp.float32), b1_2d, w2_p, b2_p)

    return out_padded[:, :n_classes]


if __name__ == "__main__":
    key = jax.random.PRNGKey(0)
    k_x, k_w1, k_b1, k_w2, k_b2 = jax.random.split(key, 5)

    # Small batch chosen NOT to be a multiple of the tile so the uneven-grid
    # (masked partial last block) path is exercised.
    batch = 10
    x = jax.random.normal(k_x, (batch, 1, 28, 28), dtype=jnp.float32)

    # PyTorch Linear shapes fc1 (28, 784), fc2 (10, 28), stored pre-transposed
    # as (in, out) for the x @ W convention.
    w1 = jax.random.normal(k_w1, (IN_DIM, HIDDEN), dtype=jnp.float32) * 0.05
    b1 = jax.random.normal(k_b1, (HIDDEN,), dtype=jnp.float32) * 0.05
    w2 = jax.random.normal(k_w2, (HIDDEN, 10), dtype=jnp.float32) * 0.05
    b2 = jax.random.normal(k_b2, (10,), dtype=jnp.float32) * 0.05

    out = jax.block_until_ready(mnist_net_forward(x, w1, b1, w2, b2))
    assert out.shape == (batch, 10)

    # Pure-JAX f32 reference (same numerics as the kernel).
    xf = x.reshape(batch, IN_DIM)
    h_ref = jnp.maximum(xf @ w1 + b1, 0.0)
    ref = jax.nn.log_softmax(h_ref @ w2 + b2, axis=-1)
    err = jnp.max(jnp.abs(out - ref))
    assert jnp.allclose(out, ref, atol=2e-3, rtol=2e-3), f"max abs err {err}"

    print("KERNEL_OK")
</pallas_src>

<mosaic_0001>
module attributes {stable_mosaic.version = 11 : i64} {
  func.func @mnist_mlp_kernel(%arg0: i32, %arg1: memref<8x784xf32, #tpu.memory_space<vmem>>, %arg2: memref<784x28xf32, #tpu.memory_space<vmem>>, %arg3: memref<1x28xf32, #tpu.memory_space<vmem>>, %arg4: memref<28x128xf32, #tpu.memory_space<vmem>>, %arg5: memref<1x128xf32, #tpu.memory_space<vmem>>, %arg6: memref<8x128xf32, #tpu.memory_space<vmem>>) attributes {dimension_semantics = [#tpu.dimension_semantics<parallel>], iteration_bounds = array<i64: 2>, scalar_prefetch = 0 : i64, scratch_operands = 0 : i64, tpu.core_type = #tpu.core_type<tc>, window_params = [{transform_indices = @transform_0, window_bounds = array<i64: 8, 784>}, {pipeline_mode = #tpu.pipeline_mode<synchronous>, transform_indices = @transform_1, window_bounds = array<i64: 784, 28>}, {pipeline_mode = #tpu.pipeline_mode<synchronous>, transform_indices = @transform_2, window_bounds = array<i64: 1, 28>}, {pipeline_mode = #tpu.pipeline_mode<synchronous>, transform_indices = @transform_3, window_bounds = array<i64: 28, 128>}, {pipeline_mode = #tpu.pipeline_mode<synchronous>, transform_indices = @transform_4, window_bounds = array<i64: 1, 128>}, {transform_indices = @transform_5, window_bounds = array<i64: 8, 128>}]} {
    %c0 = arith.constant 0 : index
    %c0_0 = arith.constant 0 : index
    %0 = vector.load %arg1[%c0, %c0_0] : memref<8x784xf32, #tpu.memory_space<vmem>>, vector<8x784xf32>
    %c0_1 = arith.constant 0 : index
    %c0_2 = arith.constant 0 : index
    %1 = vector.load %arg2[%c0_1, %c0_2] : memref<784x28xf32, #tpu.memory_space<vmem>>, vector<784x28xf32>
    %cst = arith.constant dense<0.000000e+00> : vector<8x28xf32>
    %2 = tpu.matmul %0, %1, %cst {dimension_numbers = #tpu.dot_dimension_numbers<[1], [0], [0], [1], [0, 0, 1, 1], [], []>} : vector<8x784xf32>, vector<784x28xf32>, vector<8x28xf32> -> vector<8x28xf32>
    %c0_3 = arith.constant 0 : index
    %c0_4 = arith.constant 0 : index
    %3 = vector.load %arg3[%c0_3, %c0_4] : memref<1x28xf32, #tpu.memory_space<vmem>>, vector<1x28xf32>
    %4 = vector.broadcast %3 : vector<1x28xf32> to vector<8x28xf32>
    %5 = arith.addf %2, %4 : vector<8x28xf32>
    %cst_5 = arith.constant 0.000000e+00 : f32
    %6 = vector.broadcast %cst_5 : f32 to vector<8x28xf32>
    %7 = arith.maximumf %5, %6 : vector<8x28xf32>
    %c0_6 = arith.constant 0 : index
    %c0_7 = arith.constant 0 : index
    %8 = vector.load %arg4[%c0_6, %c0_7] : memref<28x128xf32, #tpu.memory_space<vmem>>, vector<28x128xf32>
    %cst_8 = arith.constant dense<0.000000e+00> : vector<8x128xf32>
    %9 = tpu.matmul %7, %8, %cst_8 {dimension_numbers = #tpu.dot_dimension_numbers<[1], [0], [0], [1], [0, 0, 1, 1], [], []>} : vector<8x28xf32>, vector<28x128xf32>, vector<8x128xf32> -> vector<8x128xf32>
    %c0_9 = arith.constant 0 : index
    %c0_10 = arith.constant 0 : index
    %10 = vector.load %arg5[%c0_9, %c0_10] : memref<1x128xf32, #tpu.memory_space<vmem>>, vector<1x128xf32>
    %11 = vector.broadcast %10 : vector<1x128xf32> to vector<8x128xf32>
    %12 = arith.addf %9, %11 : vector<8x128xf32>
    %cst_11 = arith.constant dense<0xFF800000> : vector<8xf32>
    %13 = vector.multi_reduction <maximumf>, %12, %cst_11 [1] : vector<8x128xf32> to vector<8xf32>
    %14 = vector.shape_cast %13 : vector<8xf32> to vector<8x1xf32>
    %15 = vector.broadcast %14 : vector<8x1xf32> to vector<8x128xf32>
    %16 = arith.subf %12, %15 : vector<8x128xf32>
    %17 = math.exp %16 : vector<8x128xf32>
    %cst_12 = arith.constant dense<0.000000e+00> : vector<8xf32>
    %18 = vector.multi_reduction <add>, %17, %cst_12 [1] : vector<8x128xf32> to vector<8xf32>
    %19 = vector.shape_cast %18 : vector<8xf32> to vector<8x1xf32>
    %20 = math.log %19 : vector<8x1xf32>
    %21 = vector.broadcast %20 : vector<8x1xf32> to vector<8x128xf32>
    %22 = arith.subf %16, %21 : vector<8x128xf32>
    %c0_13 = arith.constant 0 : index
    %c0_14 = arith.constant 0 : index
    %23 = vector.load %arg6[%c0_13, %c0_14] : memref<8x128xf32, #tpu.memory_space<vmem>>, vector<8x128xf32>
    tpu.vector_store %arg6[%c0_13, %c0_14], %22 {strides = array<i32>} : memref<8x128xf32, #tpu.memory_space<vmem>>, vector<8x128xf32>,
    return
  }
  func.func @transform_0(%arg0: i32) -> (i32, i32) {
    %c0_i32 = arith.constant 0 : i32
    %c0_i32_0 = arith.constant 0 : i32
    return %arg0, %c0_i32 : i32, i32
  }
  func.func @transform_1(%arg0: i32) -> (i32, i32) {
    %c0_i32 = arith.constant 0 : i32
    %c0_i32_0 = arith.constant 0 : i32
    %c0_i32_1 = arith.constant 0 : i32
    return %c0_i32, %c0_i32_0 : i32, i32
  }
  func.func @transform_2(%arg0: i32) -> (i32, i32) {
    %c0_i32 = arith.constant 0 : i32
    %c0_i32_0 = arith.constant 0 : i32
    %c0_i32_1 = arith.constant 0 : i32
    return %c0_i32, %c0_i32_0 : i32, i32
  }
  func.func @transform_3(%arg0: i32) -> (i32, i32) {
    %c0_i32 = arith.constant 0 : i32
    %c0_i32_0 = arith.constant 0 : i32
    %c0_i32_1 = arith.constant 0 : i32
    return %c0_i32, %c0_i32_0 : i32, i32
  }
  func.func @transform_4(%arg0: i32) -> (i32, i32) {
    %c0_i32 = arith.constant 0 : i32
    %c0_i32_0 = arith.constant 0 : i32
    %c0_i32_1 = arith.constant 0 : i32
    return %c0_i32, %c0_i32_0 : i32, i32
  }
  func.func @transform_5(%arg0: i32) -> (i32, i32) {
    %c0_i32 = arith.constant 0 : i32
    %c0_i32_0 = arith.constant 0 : i32
    return %arg0, %c0_i32 : i32, i32
  }
}

</mosaic_0001>

<bundles_post_ra>
// kernel: tpu_custom_call.1
= control target key start
LH: loop header
LB: loop body
LE: loop exit
PB: predicated region body
PF: predicated region fallthrough
CT: control target
= control target key end

     0   :  { %10 = vsyncpa [#allocation3], 0  ;;  %s1163_s0 = inlined_call_operand.vmem [shape: f32[10,784], index: 0, kind: input, shape index: {}]   ;;  %s1164_s1 = inlined_call_operand.vmem [shape: f32[784,28], index: 1, kind: input, shape index: {}]   ;;  %s1165_s2 = inlined_call_operand.vmem [shape: f32[1,28], index: 2, kind: input, shape index: {}]   ;;  %s1166_s3 = inlined_call_operand.vmem [shape: f32[28,128], index: 3, kind: input, shape index: {}]   ;;  %s1167_s4 = inlined_call_operand.vmem [shape: f32[1,128], index: 4, kind: input, shape index: {}]   ;;  %s1168_s5 = inlined_call_operand.hbm [shape: f32[10,128], index: 5, kind: output, shape index: {}]  }
   0x1   :  { %12 = vsyncpa [#allocation3 + $0x1], 0  ;;  %s752_s18 = smov 0   ;;  %s754_s19 = smov 0  }
   0x2   :  { %s756_s20 = smov 0   ;;  %s758_s21 = smov 0  }
   0x3 LB: > { %s773_s22 = sadd.s32 4294967295, %s720_s21   ;;  %s599_s23 = sadd.s32 4294967294, %s720_s21   ;;  %s720_s21 = sphi %s758_s21, %s1174_s21   ;;  %s716_s20 = sphi %s756_s20, %s1173_s20   ;;  %s712_s19 = sphi %s754_s19, %s1172_s19   ;;  %s708_s18 = sphi %s752_s18, %s1171_s18  }
   0x4   : > { %s777_s24 = sadd.s32 1, %s720_s21   ;;  %s135_s25 = sadd.s32 1, %s716_s20 }
   0x5   : > { %s132_s26 = ssub.s32 %s720_s21, %s777_s24  ;;  %p145_p0 = scmp.ne.s32.totalorder %s716_s20, %s712_s19 }
   0x6   : > { %p133_p1 = scmp.eq.s32.totalorder %s132_s26, 0  ;;  %p146_p2 = scmp.eq.s32.totalorder %s773_s22, 1 }
   0x7   : > { %p151_p3 = scmp.ne.s32.totalorder %s712_s19, %s708_s18  ;;  %p152_p4 = scmp.eq.s32.totalorder %s599_s23, 1 }
   0x8   : > { %s788_s27 = scalar_select %p133_p1, %s716_s20, %s135_s25  }
   0x9   : > { %p790_p5 = por %p146_p2, %p145_p0  ;;  %p794_p6 = por %p152_p4, %p151_p3 }
   0xa   : > { %p602_p7 = scmp.ge.s32.totalorder %s720_s21, 1  ;;  %p190_p8 = scmp.lt.s32.totalorder %s720_s21, 3 }
   0xc   : > { %p191_p9 = pnand %p602_p7, %p190_p8 }
   0xd   : > { %p218_p10 = scmp.lt.s32.totalorder (!%p191_p9), %s773_s22, 1  ;;  %s215_s13 = sand.u32 (!%p191_p9), 1, %s712_s19  }
   0xe   : > { %194 = sbr.rel (%p191_p9) target bundleno = 608 (0x260), region = 40  ;;  %s603_s14 = sshll.u32 (!%p191_p9), %s215_s13, 3 }
   0xf   : > { %s609_s16 = sshll.u32 (!%p191_p9), %s773_s22, 3  ;;  %s217_s6 = scalar_lea.vmem (!%p191_p9), [#allocation2], %s603_s14 }
  0x10   : > { %s535_s26 = scalar_lea.hbm (!%p191_p9), %s1168_s5, %s609_s16  ;;  %s537_s7 = sshll.u32 (!%p191_p9), %s217_s6, 4  ;;  %s538_s7 = int_to_ptr.vmem [resolvable:$true] %s537_s7 }
  0x11   : > { %s539_s8 = sshll.u32 (!%p191_p9), %s535_s26, 4  ;;  %s525_s9 = scalar_lea.sflag (!%p191_p9), [#allocation3], %s215_s13  ;;  %s540_s8 = int_to_ptr.hbm [resolvable:$true] %s539_s8 }
  0x12   : > { %s678_s11 = scalar_lea.hbm (!%p191_p9), %s1168_s5, 16 }
  0x13   : > { %v245_v0 = vld [vmem:[%s1164_s1 + $0x78] sm:$0xff]  ;;  %v244_v1 = vld [vmem:[%s1164_s1 + $0x70] sm:$0xff]  ;;  %v243_v4 = vld [vmem:[%s1164_s1 + $0x68] sm:$0xff]  ;;  %s963_s15 = scalar_select %p218_p10, %s773_s22, 1  ;;  %vm332_vm0 = vcmask 130048   ;;  %vm489_vm1 = vcmask 1043456  }
  0x14   : > { %v261_v2 = vld [vmem:[%s1164_s1 + $0xf8] sm:$0xff]  ;;  %336 = vmatpush.msra.mxu0 %v245_v0  ;;  %v260_v3 = vld [vmem:[%s1164_s1 + $0xf0] sm:$0xff]  ;;  %v259_v5 = vld [vmem:[%s1164_s1 + $0xe8] sm:$0xff]  ;;  %vm485_vm2 = vcmask 228352  }
  0x15   : > { %356 = vmatpush.msra.mxu1 %v261_v2  ;;  %v242_v6 = vld [vmem:[%s1164_s1 + $0x60] sm:$0xff]  ;;  %v241_v8 = vld [vmem:[%s1164_s1 + $0x58] sm:$0xff]  ;;  %v240_v10 = vld [vmem:[%s1164_s1 + $0x50] sm:$0xff]  ;;  %s612_s17 = smul.u32 56, %s963_s15 }
  0x16   : > { %337 = vmatpush.msra.mxu0 %v244_v1  ;;  %v258_v7 = vld [vmem:[%s1164_s1 + $0xe0] sm:$0xff]  ;;  %v257_v9 = vld [vmem:[%s1164_s1 + $0xd8] sm:$0xff]  ;;  %v256_v12 = vld [vmem:[%s1164_s1 + $0xd0] sm:$0xff] }
  0x17   : > { %357 = vmatpush.msra.mxu1 %v260_v3  ;;  %v277_v11 = vld [vmem:[%s1164_s1 + $0x178] sm:$0xff]  ;;  %v276_v13 = vld [vmem:[%s1164_s1 + $0x170] sm:$0xff]  ;;  %v275_v15 = vld [vmem:[%s1164_s1 + $0x168] sm:$0xff]  ;;  %s1017_s30 = scalar_lea.vmem %s1163_s0, %s612_s17 }
  0x18   : > { %338 = vmatpush.msra.mxu0 %v243_v4  ;;  %376 = vmatpush.msra.mxu2 %v277_v11  ;;  %v293_v14 = vld [vmem:[%s1164_s1 + $0x1f8] sm:$0xff]  ;;  %v292_v16 = vld [vmem:[%s1164_s1 + $0x1f0] sm:$0xff]  ;;  %v239_v17 = vld [vmem:[%s1164_s1 + $0x48] sm:$0xff] }
  0x19   : > { %358 = vmatpush.msra.mxu1 %v259_v5  ;;  %v255_v18 = vld [vmem:[%s1164_s1 + $0xc8] sm:$0xff]  ;;  %396 = vmatpush.msra.mxu3 %v293_v14  ;;  %v274_v19 = vld [vmem:[%s1164_s1 + $0x160] sm:$0xff]  ;;  %v273_v23 = vld [vmem:[%s1164_s1 + $0x158] sm:$0xff] }
  0x1a   : > { %339 = vmatpush.msra.mxu0 %v242_v6  ;;  %377 = vmatpush.msra.mxu2 %v276_v13  ;;  %v291_v20 = vld [vmem:[%s1164_s1 + $0x1e8] sm:$0xff]  ;;  %v238_v21 = vld [vmem:[%s1164_s1 + $0x40] sm:$0xff]  ;;  %v237_v25 = vld [vmem:[%s1164_s1 + $0x38] sm:$0xff] }
  0x1b   : > { %359 = vmatpush.msra.mxu1 %v258_v7  ;;  %v254_v22 = vld [vmem:[%s1164_s1 + $0xc0] sm:$0xff]  ;;  %397 = vmatpush.msra.mxu3 %v292_v16  ;;  %v253_v26 = vld [vmem:[%s1164_s1 + $0xb8] sm:$0xff]  ;;  %v272_v27 = vld [vmem:[%s1164_s1 + $0x150] sm:$0xff] }
  0x1c   : > { %340 = vmatpush.msra.mxu0 %v241_v8  ;;  %378 = vmatpush.msra.mxu2 %v275_v15  ;;  %v290_v24 = vld [vmem:[%s1164_s1 + $0x1e0] sm:$0xff]  ;;  %v289_v28 = vld [vmem:[%s1164_s1 + $0x1d8] sm:$0xff]  ;;  %v236_v29 = vld [vmem:[%s1164_s1 + $0x30] sm:$0xff] }
  0x1d   : > { %360 = vmatpush.msra.mxu1 %v257_v9  ;;  %398 = vmatpush.msra.mxu3 %v291_v20  ;;  %v252_v30 = vld [vmem:[%s1164_s1 + $0xb0] sm:$0xff]  ;;  %v271_v31 = vld [vmem:[%s1164_s1 + $0x148] sm:$0xff]  ;;  %v270_v35 = vld [vmem:[%s1164_s1 + $0x140] sm:$0xff] }
  0x1e   : > { %341 = vmatpush.msra.mxu0 %v240_v10  ;;  %379 = vmatpush.msra.mxu2 %v274_v19  ;;  %v288_v32 = vld [vmem:[%s1164_s1 + $0x1d0] sm:$0xff]  ;;  %v235_v33 = vld [vmem:[%s1164_s1 + $0x28] sm:$0xff]  ;;  %v234_v37 = vld [vmem:[%s1164_s1 + $0x20] sm:$0xff] }
  0x1f   : > { %361 = vmatpush.msra.mxu1 %v256_v12  ;;  %399 = vmatpush.msra.mxu3 %v290_v24  ;;  %v251_v34 = vld [vmem:[%s1164_s1 + $0xa8] sm:$0xff]  ;;  %v250_v38 = vld [vmem:[%s1164_s1 + $0xa0] sm:$0xff]  ;;  %v269_v39 = vld [vmem:[%s1164_s1 + $0x138] sm:$0xff] }
  0x20   : > { %342 = vmatpush.msra.mxu0 %v239_v17  ;;  %380 = vmatpush.msra.mxu2 %v273_v23  ;;  %v287_v36 = vld [vmem:[%s1164_s1 + $0x1c8] sm:$0xff]  ;;  %v286_v40 = vld [vmem:[%s1164_s1 + $0x1c0] sm:$0xff]  ;;  %v233_v41 = vld [vmem:[%s1164_s1 + $0x18] sm:$0xff] }
  0x21   : > { %362 = vmatpush.msra.mxu1 %v255_v18  ;;  %400 = vmatpush.msra.mxu3 %v289_v28  ;;  %v249_v42 = vld [vmem:[%s1164_s1 + $0x98] sm:$0xff]  ;;  %v268_v43 = vld [vmem:[%s1164_s1 + $0x130] sm:$0xff]  ;;  %v267_v47 = vld [vmem:[%s1164_s1 + $0x128] sm:$0xff] }
  0x22   : > { %343 = vmatpush.msra.mxu0 %v238_v21  ;;  %381 = vmatpush.msra.mxu2 %v272_v27  ;;  %v285_v44 = vld [vmem:[%s1164_s1 + $0x1b8] sm:$0xff]  ;;  %v232_v45 = vld [vmem:[%s1164_s1 + $0x10] sm:$0xff]  ;;  %v231_v49 = vld [vmem:[%s1164_s1 + $0x8] sm:$0xff] }
  0x23   : > { %363 = vmatpush.msra.mxu1 %v254_v22  ;;  %401 = vmatpush.msra.mxu3 %v288_v32  ;;  %v248_v46 = vld [vmem:[%s1164_s1 + $0x90] sm:$0xff]  ;;  %v247_v50 = vld [vmem:[%s1164_s1 + $0x88] sm:$0xff]  ;;  %v266_v51 = vld [vmem:[%s1164_s1 + $0x120] sm:$0xff] }
  0x24   : > { %344 = vmatpush.msra.mxu0 %v237_v25  ;;  %382 = vmatpush.msra.mxu2 %v271_v31  ;;  %v284_v48 = vld [vmem:[%s1164_s1 + $0x1b0] sm:$0xff]  ;;  %v283_v52 = vld [vmem:[%s1164_s1 + $0x1a8] sm:$0xff]  ;;  %v230_v53 = vld [vmem:[%s1164_s1] sm:$0xff] }
  0x25   : > { %364 = vmatpush.msra.mxu1 %v253_v26  ;;  %402 = vmatpush.msra.mxu3 %v287_v36  ;;  %v246_v54 = vld [vmem:[%s1164_s1 + $0x80] sm:$0xff]  ;;  %v309_v55 = vld [vmem:[%s1164_s1 + $0x278] sm:$0xff]  ;;  %v308_v59 = vld [vmem:[%s1164_s1 + $0x270] sm:$0xff] }
  0x26   : > { %345 = vmatpush.msra.mxu0 %v236_v29  ;;  %383 = vmatpush.msra.mxu2 %v270_v35  ;;  %v325_v56 = vld [vmem:[%s1164_s1 + $0x2f8] sm:$0xff]  ;;  %v282_v58 = vld [vmem:[%s1164_s1 + $0x1a0] sm:$0xff]  ;;  %v324_v60 = vld [vmem:[%s1164_s1 + $0x2f0] sm:$0xff] }
  0x27   : > { %365 = vmatpush.msra.mxu1 %v252_v30  ;;  %403 = vmatpush.msra.mxu3 %v286_v40  ;;  %v265_v57 = vld [vmem:[%s1164_s1 + $0x118] sm:$0xff]  ;;  %v264_v61 = vld [vmem:[%s1164_s1 + $0x110] sm:$0xff]  ;;  %v307_v63 = vld [vmem:[%s1164_s1 + $0x268] sm:$0xff] }
  0x28   : > { %346 = vmatpush.msra.mxu0 %v235_v33  ;;  %384 = vmatpush.msra.mxu2 %v269_v39  ;;  %v281_v62 = vld [vmem:[%s1164_s1 + $0x198] sm:$0xff]  ;;  %v323_v0 = vld [vmem:[%s1164_s1 + $0x2e8] sm:$0xff]  ;;  %v306_v1 = vld [vmem:[%s1164_s1 + $0x260] sm:$0xff] }
  0x29   : > { %366 = vmatpush.msra.mxu1 %v251_v34  ;;  %404 = vmatpush.msra.mxu3 %v285_v44  ;;  %v263_v2 = vld [vmem:[%s1164_s1 + $0x108] sm:$0xff]  ;;  %v280_v3 = vld [vmem:[%s1164_s1 + $0x190] sm:$0xff]  ;;  %v322_v4 = vld [vmem:[%s1164_s1 + $0x2e0] sm:$0xff] }
  0x2a   : > { %347 = vmatpush.msra.mxu0 %v234_v37  ;;  %385 = vmatpush.msra.mxu2 %v268_v43  ;;  %v262_v5 = vld [vmem:[%s1164_s1 + $0x100] sm:$0xff]  ;;  %v279_v6 = vld [vmem:[%s1164_s1 + $0x188] sm:$0xff]  ;;  %v305_v7 = vld [vmem:[%s1164_s1 + $0x258] sm:$0xff] }
  0x2b   : > { %367 = vmatpush.msra.mxu1 %v250_v38  ;;  %405 = vmatpush.msra.mxu3 %v284_v48  ;;  %v321_v8 = vld [vmem:[%s1164_s1 + $0x2d8] sm:$0xff]  ;;  %v225_v9 = vld [vmem:[%s1017_s30 + $0x10] sm:$0xff]  ;;  %v278_v10 = vld [vmem:[%s1164_s1 + $0x180] sm:$0xff] }
  0x2c   : > { %348 = vmatpush.msra.mxu0 %v233_v41  ;;  %386 = vmatpush.msra.mxu2 %v267_v47  ;;  %v304_v11 = vld [vmem:[%s1164_s1 + $0x250] sm:$0xff]  ;;  %v327_v13 = vld [vmem:[%s1164_s1 + $0x308] sm:$0xff]  ;;  %v223_v14 = vld [vmem:[%s1017_s30] sm:$0xff] }
  0x2d   : > { %368 = vmatpush.msra.mxu1 %v249_v42  ;;  %406 = vmatpush.msra.mxu3 %v283_v52  ;;  %v320_v12 = vld [vmem:[%s1164_s1 + $0x2d0] sm:$0xff]  ;;  %v303_v15 = vld [vmem:[%s1164_s1 + $0x248] sm:$0xff]  ;;  %v226_v17 = vld [vmem:[%s1017_s30 + $0x18] sm:$0xff] }
  0x2e   : > { %349 = vmatpush.msra.mxu0 %v232_v45  ;;  %387 = vmatpush.msra.mxu2 %v266_v51  ;;  %v319_v16 = vld [vmem:[%s1164_s1 + $0x2c8] sm:$0xff]  ;;  %v302_v19 = vld [vmem:[%s1164_s1 + $0x240] sm:$0xff]  ;;  %v301_v22 = vld [vmem:[%s1164_s1 + $0x238] sm:$0xff] }
  0x2f   : > { %369 = vmatpush.msra.mxu1 %v248_v46  ;;  %407 = vmatpush.msra.mxu3 %v282_v58  ;;  %v224_v18 = vld [vmem:[%s1017_s30 + $0x8] sm:$0xff]  ;;  %v318_v20 = vld [vmem:[%s1164_s1 + $0x2c0] sm:$0xff]  ;;  %v317_v23 = vld [vmem:[%s1164_s1 + $0x2b8] sm:$0xff] }
  0x30   : > { %350 = vmatpush.msra.mxu0 %v231_v49  ;;  %388 = vmatpush.msra.mxu2 %v265_v57  ;;  %v326_v21 = vld [vmem:[%s1164_s1 + $0x300] sm:$0xff]  ;;  %v229_v24 = vld [vmem:[%s1017_s30 + $0x30] sm:$0xff]  ;;  %v299_v27 = vld [vmem:[%s1164_s1 + $0x228] sm:$0xff] }
  0x31   : > { %370 = vmatpush.msra.mxu1 %v247_v50  ;;  %408 = vmatpush.msra.mxu3 %v281_v62  ;;  %v300_v25 = vld [vmem:[%s1164_s1 + $0x230] sm:$0xff]  ;;  %v315_v28 = vld [vmem:[%s1164_s1 + $0x2a8] sm:$0xff]  ;;  %v298_v29 = vld [vmem:[%s1164_s1 + $0x220] sm:$0xff] }
  0x32   : > { %351 = vmatpush.msra.mxu0 %v230_v53  ;;  %389 = vmatpush.msra.mxu2 %v264_v61  ;;  %v316_v26 = vld [vmem:[%s1164_s1 + $0x2b0] sm:$0xff]  ;;  %v314_v30 = vld [vmem:[%s1164_s1 + $0x2a0] sm:$0xff]  ;;  %v297_v31 = vld [vmem:[%s1164_s1 + $0x218] sm:$0xff] }
  0x33   : > { %371 = vmatpush.msra.mxu1 %v246_v54  ;;  %409 = vmatpush.msra.mxu3 %v280_v3  ;;  %v313_v32 = vld [vmem:[%s1164_s1 + $0x298] sm:$0xff]  ;;  %v296_v33 = vld [vmem:[%s1164_s1 + $0x210] sm:$0xff]  ;;  %v295_v35 = vld [vmem:[%s1164_s1 + $0x208] sm:$0xff] }
  0x34   : > { %416 = vmatpush.msrb.mxu0 %v309_v55  ;;  %390 = vmatpush.msra.mxu2 %v263_v2  ;;  %v312_v34 = vld [vmem:[%s1164_s1 + $0x290] sm:$0xff]  ;;  %v311_v36 = vld [vmem:[%s1164_s1 + $0x288] sm:$0xff]  ;;  %v294_v37 = vld [vmem:[%s1164_s1 + $0x200] sm:$0xff] }
  0x35   : > { %436 = vmatpush.msrb.mxu1 %v325_v56  ;;  %410 = vmatpush.msra.mxu3 %v279_v6  ;;  %v310_v38 = vld [vmem:[%s1164_s1 + $0x280] sm:$0xff]  ;;  %v228_v40 = vld [vmem:[%s1017_s30 + $0x28] sm:$0xff]  ;;  %v480_v41 = vld [vmem:[%s1166_s3 + $0x18] sm:$0xf] }
  0x36   : > { %417 = vmatpush.msrb.mxu0 %v308_v59  ;;  %391 = vmatpush.msra.mxu2 %v262_v5  ;;  %v227_v39 = vld [vmem:[%s1017_s30 + $0x20] sm:$0xff]  ;;  %v479_v42 = vld [vmem:[%s1166_s3 + $0x10] sm:$0xff]  ;;  %v478_v43 = vld [vmem:[%s1166_s3 + $0x8] sm:$0xff]  ;;  %s672_s30 = sshra.s32 %s540_s8, 4  ;;  %s673_s30 = int_to_ptr.hbm [resolvable:$true] %s672_s30 }
  0x37   : > { %437 = vmatpush.msrb.mxu1 %v324_v60  ;;  %392 = vmatmul.f32.vlgmr.msra.gmra.mxu2 %v225_v9  ;;  %v477_v44 = vld [vmem:[%s1166_s3] sm:$0xff]  ;;  %s674_s15 = scalar_lea.hbm %s673_s30, 8  ;;  %p679_p0 = scmp.lt.s32.totalorder %s673_s30, %s1168_s5 }
  0x38   : > { %418 = vmatpush.msrb.mxu0 %v307_v63  ;;  %411 = vmatpush.msra.mxu3 %v278_v10  ;;  %v652_v45 = vld [vmem:[%s1165_s2] ss:$0 sm:$0xff]  ;;  %p675_p11 = scmp.ne.s32.totalorder %s673_s30, %s674_s15  ;;  %p680_p1 = scmp.lt.s32.totalorder %s678_s11, %s674_s15 }
  0x39   : > { %438 = vmatpush.msrb.mxu1 %v323_v0  ;;  %470 = vmatpush.msrb.mxu2 %v327_v13  ;;  %v653_v61 = vld [vmem:[%s1167_s4] ss:$0 sm:$0xff] }
  0x3a   : > { %419 = vmatpush.msrb.mxu0 %v306_v1  ;;  %412 = vmatmul.f32.vlgmr.msra.gmra.mxu3 %v226_v17  ;;  %p676_p12 = pnand %p675_p11, %p790_p5  ;;  %p681_p2 = por %p680_p1, %p679_p0 }
  0x3b   : > { %439 = vmatpush.msrb.mxu1 %v322_v4  ;;  %352 = vmatmul.f32.vlgmr.msra.gmra.mxu0 %v223_v14 }
  0x3c   : > { %420 = vmatpush.msrb.mxu0 %v305_v7  ;;  %372 = vmatmul.f32.vlgmr.msra.gmra.mxu1 %v224_v18  ;;  %p677_p13 = pneg %p676_p12 }
  0x3d   : > { %440 = vmatpush.msrb.mxu1 %v321_v8  ;;  %471 = vmatpush.msrb.mxu2 %v326_v21 }
  0x3e   : > { %421 = vmatpush.msrb.mxu0 %v304_v11  ;;  %606 = vmatpush.msk.msrb.mxu3 %vm489_vm1, %v480_v41  ;;  %p682_p3 = pnand %p681_p2, %p677_p13 }
  0x3f   : > { %441 = vmatpush.msrb.mxu1 %v320_v12  ;;  %605 = vmatmul.msk.f32.vlgmr.msrb.gmra.mxu2 %vm332_vm0, %v229_v24 }
  0x40   : > { %422 = vmatpush.msrb.mxu0 %v303_v15  ;;  %506 = vmatpush.msrb.mxu3 %v479_v42 }
  0x41   : > { %442 = vmatpush.msrb.mxu1 %v319_v16 }
  0x42   : > { %423 = vmatpush.msrb.mxu0 %v302_v19  ;;  %507 = vmatpush.msrb.mxu3 %v478_v43 }
  0x43   : > { %443 = vmatpush.msrb.mxu1 %v318_v20 }
  0x44   : > { %424 = vmatpush.msrb.mxu0 %v301_v22  ;;  %508 = vmatpush.msrb.mxu3 %v477_v44 }
  0x45   : > { %444 = vmatpush.msrb.mxu1 %v317_v23 }
  0x46   : > { %425 = vmatpush.msrb.mxu0 %v300_v25 }
  0x47   : > { %445 = vmatpush.msrb.mxu1 %v316_v26 }
  0x48   : > { %426 = vmatpush.msrb.mxu0 %v299_v27 }
  0x49   : > { %446 = vmatpush.msrb.mxu1 %v315_v28 }
  0x4a   : > { %427 = vmatpush.msrb.mxu0 %v298_v29 }
  0x4b   : > { %447 = vmatpush.msrb.mxu1 %v314_v30 }
  0x4c   : > { %428 = vmatpush.msrb.mxu0 %v297_v31 }
  0x4d   : > { %448 = vmatpush.msrb.mxu1 %v313_v32 }
  0x4e   : > { %429 = vmatpush.msrb.mxu0 %v296_v33 }
  0x4f   : > { %449 = vmatpush.msrb.mxu1 %v312_v34 }
  0x50   : > { %430 = vmatpush.msrb.mxu0 %v295_v35 }
  0x51   : > { %450 = vmatpush.msrb.mxu1 %v311_v36 }
  0x52   : > { %431 = vmatpush.msrb.mxu0 %v294_v37 }
  0x53   : > { %451 = vmatpush.msrb.mxu1 %v310_v38  ;;  %432 = vmatmul.f32.vlgmr.msrb.gmra.mxu0 %v227_v39 }
  0x54   : > { %452 = vmatmul.f32.vlgmr.msrb.gmra.mxu1 %v228_v40 }
  0xb8   : > { %v353_v46 = vpop.f32.mrf.mxu0 }
  0xb9   : > { %v354_v47 = vadd.f32 %v652_v45, %v353_v46  ;;  %v373_v48 = vpop.f32.mrf.mxu1 }
  0xba   : > { %v393_v50 = vpop.f32.mrf.mxu2 }
  0xbb   : > { %v374_v49 = vadd.f32 %v373_v48, %v354_v47 }
  0xbd   : > { %v394_v51 = vadd.f32 %v393_v50, %v374_v49  ;;  %v413_v52 = vpop.f32.mrf.mxu3 }
  0xbf   : > { %v414_v53 = vadd.f32 %v413_v52, %v394_v51 }
  0xc2   : > { %v473_v57 = vpop.f32.mrf.mxu2 }
  0xd0   : > { %v433_v54 = vpop.f32.mrf.mxu0 }
  0xd1   : > { %v453_v55 = vpop.f32.mrf.mxu1  ;;  %v434_v56 = vadd.f32 %v433_v54, %v414_v53 }
  0xd3   : > { %v454_v58 = vadd.f32 %v453_v55, %v434_v56 }
  0xd5   : > { %v474_v59 = vadd.f32 %v473_v57, %v454_v58 }
  0xd7   : > { %v476_v60 = vmax.f32 %v474_v59, 0.0 }
  0xd9   : > { %607 = vmatmul.msk.f32.vlgmr.msrb.gmra.mxu3 %vm485_vm2, %v476_v60 }
 0x15c   : > { %v510_v62 = vpop.f32.mrf.mxu3 }
 0x15d   : > { %v511_v63 = vadd.f32 %v653_v61, %v510_v62 }
 0x15f   : > { %513 = vmax.xlane.f32.xlu0 %v511_v63 }
 0x1d2   : > { %v514_v0 = vpop.xlane.xlu0 %513 }
 0x1d3   : > { %v515_v1 = vsub.f32 %v511_v63, %v514_v0 }
 0x1d5   : > { %v516_v2 = vmul.f32 1.442695, %v515_v1 }
 0x1d7   : > { %654 = vpow2.f32 %v516_v2 }
 0x1dd   : > { %v655_v3 = vpop.eup %654 }
 0x1de   : > { %518 = vadd.xlane.f32.xlu0 %v655_v3 }
 0x251   : > { %v519_v4 = vpop.xlane.xlu0 %518 }
 0x252   : > { %656 = vlog2.f32 %v519_v4 }
 0x258   : > { %v657_v5 = vpop.eup %656 }
 0x259   : > { %v521_v6 = vmul.f32 0.6931472, %v657_v5 }
 0x25b   : > { %v522_v7 = vsub.f32 %v515_v1, %v521_v6 }
 0x25d   : > { %523 = vst [vmem:[%s217_s6] sm:$0xff] %v522_v7 }
 0x25e   : > { %685 = shalt.err (!%p682_p3)
}
 0x25f   : > { %613 = dma.vmem_to_hbm [thread:$0]  (%p790_p5), %s538_s7, 128, %s540_s8, %s525_s9  }
 0x260 PF: > { %p619_p4 = scmp.ge.s32.totalorder %s720_s21, 2  ;;  %s551_s13 = sand.u32 1, %s708_s18  }
 0x261   : > { %s552_s14 = scalar_lea.sflag [#allocation3], %s551_s13 }
 0x262   : > { %p616_p7 = pnand %p619_p4, %p794_p6 }
 0x264   : > { %p617_p8 = pneg %p616_p7 }
 0x266   : > { %703 = dma.done.wait (%p617_p8), %s552_s14, 128  }
 0x267   : > { %705 = vsyncadd (%p617_p8), %s552_s14, 4294967168  ;;  %p15_p9 = scmp.ge.s32.totalorder %s777_s24, 4   ;;  %s1171_s18 = smov %s712_s19 }
 0x268   : > { %s1172_s19 = smov %s716_s20  ;;  %s1173_s20 = smov %s788_s27 }
 0x269   : > { %s1174_s21 = smov %s777_s24  ;;  %17 = sbr.rel (!%p15_p9) target bundleno = 3 (0x3), region = 75 }
 0x26e   :  { %558 = vsyncpa [#allocation3], 1 }
 0x26f   :  { %560 = vsyncpa [#allocation3 + $0x1], 1 }

</bundles_post_ra>
